<compile_context>
chip_gen: v5e
topology: v5e:2x2
jax: 0.10.0
libtpu: 0.0.40
codegen_flags: <defaults>
</compile_context>

<pallas_src>
import functools

import numpy as np

import jax
import jax.numpy as jnp
from jax import lax
from jax.experimental import pallas as pl
from jax.experimental.pallas import tpu as pltpu


def _round_up(x, m):
    return (x + m - 1) // m * m


def _deconv_kernel(x_hbm, w_ref, o_ref, xbuf, xcat, sem, *,
                   kH, kW, Wp, Ltile, Lin_tile):
    # x_hbm : (N, Cin, Lin)            flattened padded/dilated input, in HBM
    # w_ref : (Cout, kH*kW*Cin)        fused flipped-kernel weight (VMEM resident)
    # o_ref : (Cout, Ltile)            lane-dense flat output block
    # xbuf  : (2, Cin, Lin_tile)       double-buffered halo window (scratch)
    # xcat  : (kH*kW*Cin, Ltile)       fused-tap MXU operand (scratch)
    # sem   : (2,)                     DMA semaphores
    n = pl.program_id(0)
    t = pl.program_id(1)
    num_t = pl.num_programs(1)
    cin = xbuf.shape[1]

    def tile_copy(tt, slot):
        start = pl.multiple_of(tt * Ltile, 128)
        return pltpu.make_async_copy(
            x_hbm.at[n, :, pl.ds(start, Lin_tile)],
            xbuf.at[slot],
            sem.at[slot])

    slot = lax.rem(t, 2)

    @pl.when(t == 0)
    def _():
        tile_copy(t, slot).start()          # prime the pipeline for this image

    tile_copy(t, slot).wait()               # halo window for tile t is in VMEM

    @pl.when(t + 1 < num_t)
    def _():
        tile_copy(t + 1, 1 - slot).start()  # prefetch next tile (overlaps compute)

    # Stage the kH*kW tap slabs into one (kH*kW*Cin, Ltile) operand so the MXU
    # sees a single matmul with a deep contraction and no per-tap f32 RMW.
    xt = xbuf.at[slot]                      # (Cin, Lin_tile) view of current slot
    for kh in range(kH):
        for kw in range(kW):
            tap = kh * kW + kw
            off = kh * Wp + kw              # static flat offset of this tap
            xcat[tap * cin:(tap + 1) * cin, :] = xt[:, off:off + Ltile]

    o_ref[...] = jnp.dot(w_ref[...], xcat[...],
                         preferred_element_type=jnp.float32).astype(o_ref.dtype)


def reconstruct_filter_forward(feature_map, weight, stride, padding,
                               compute_dtype=jnp.bfloat16, max_tile_lanes=None):
    """ConvTranspose2d(feature_map, weight, stride, padding, bias=False).

    feature_map: (N, Cin, H, W)        Cin == original conv_layer.out_channels
    weight     : (Cin, Cout, kH, kW)   PyTorch ConvTranspose2d weight layout,
                 byte-identical to conv_layer.weight (out_ch, in_ch, kH, kW).
    """
    N, Cin, H, W = feature_map.shape
    Cin_w, Cout, kH, kW = weight.shape
    assert Cin_w == Cin, (Cin_w, Cin)
    sh, sw = (stride, stride) if isinstance(stride, int) else tuple(stride)
    ph, pw = (padding, padding) if isinstance(padding, int) else tuple(padding)

    Ho = (H - 1) * sh - 2 * ph + kH
    Wo = (W - 1) * sw - 2 * pw + kW
    assert Ho > 0 and Wo > 0, (Ho, Wo)
    Hp = Ho + kH - 1                      # padded/dilated height (valid-conv input)
    Wp = Wo + kW - 1                      # padded/dilated width
    Kc = kH * kW * Cin                    # fused contraction depth
    Lvalid = Ho * Wp                      # valid flat output length (incl. garbage cols)
    halo = (kH - 1) * Wp + (kW - 1)

    out_dtype = feature_map.dtype
    cb = jnp.dtype(compute_dtype).itemsize
    ob = jnp.dtype(out_dtype).itemsize

    # --- spatial tile size derived from a VMEM budget (v7x 64 MiB safe) -------
    if max_tile_lanes is None:
        budget = 24 * 1024 * 1024
        fixed = 2 * Cin * halo * cb + 2 * Kc * Cout * cb
        per_lane = Kc * cb + Cout * 4 + 2 * Cout * ob + 2 * Cin * cb
        max_tile_lanes = max(256, min(4096, ((budget - fixed) // per_lane) // 128 * 128))
    n_t = -(-Lvalid // max_tile_lanes)
    Ltile = _round_up(-(-Lvalid // n_t), 128)          # lane-dense output tile
    T = -(-Lvalid // Ltile)
    Lin_tile = _round_up(Ltile + halo, 128)            # input halo window per tile
    Lin_needed = (T - 1) * Ltile + Lin_tile

    # --- zero-insert (stride) + (k-1-p) edge pad (negative => crop) -----------
    base_len = Hp * Wp
    lo_h = kH - 1 - ph
    lo_w = kW - 1 - pw
    extra = max(0, Lin_needed - base_len)
    extra_rows = -(-extra // Wp)
    zero = jnp.zeros((), feature_map.dtype)
    if lo_h >= 0:
        # Fold the extra bottom zero rows (DMA window overrun) into one lax.pad.
        x_pad = lax.pad(feature_map, zero,
                        ((0, 0, 0), (0, 0, 0),
                         (lo_h, lo_h + extra_rows, sh - 1),
                         (lo_w, lo_w, sw - 1)))
        x_flat = x_pad.reshape(N, Cin, -1)
    else:
        # padding > k-1: the negative edge pad (crop) cannot be mixed with the
        # trailing zero rows in one pad entry, so append them on the flat axis.
        x_pad = lax.pad(feature_map, zero,
                        ((0, 0, 0), (0, 0, 0),
                         (lo_h, lo_h, sh - 1),
                         (lo_w, lo_w, sw - 1)))
        x_flat = x_pad.reshape(N, Cin, -1)
        if extra_rows > 0:
            x_flat = lax.pad(x_flat, zero,
                             ((0, 0, 0), (0, 0, 0), (0, extra_rows * Wp, 0)))
    Lin = x_flat.shape[-1]
    assert Lin >= Lin_needed, (Lin, Lin_needed)
    x_flat = x_flat.astype(compute_dtype)

    # Fused weight of the equivalent forward conv:
    #   W_cat[co, (kh*kW + kw)*Cin + ci] = weight[ci, co, kH-1-kh, kW-1-kw]
    w_cat = (jnp.flip(weight, axis=(2, 3))
             .transpose(1, 2, 3, 0)
             .reshape(Cout, Kc)
             .astype(compute_dtype))

    # --- VMEM / cost bookkeeping ----------------------------------------------
    vmem_need = (2 * Cin * Lin_tile * cb       # double-buffered halo windows
                 + Kc * Ltile * cb             # fused-tap MXU operand
                 + Cout * Ltile * 4            # f32 matmul result
                 + 2 * Cout * Ltile * ob       # double-buffered output block
                 + 2 * Kc * Cout * cb          # fused weight (+1 pipeline copy)
                 + (2 << 20))                  # headroom
    vmem_limit = int(min(max(vmem_need, 32 * 1024 * 1024), 56 * 1024 * 1024))

    flops = 2 * N * T * Cout * Kc * Ltile
    bytes_accessed = (N * T * Cin * Lin_tile * cb
                      + Kc * Cout * cb
                      + N * T * Cout * Ltile * ob)

    kernel = functools.partial(_deconv_kernel, kH=kH, kW=kW, Wp=Wp,
                               Ltile=Ltile, Lin_tile=Lin_tile)

    out_flat = pl.pallas_call(
        kernel,
        out_shape=jax.ShapeDtypeStruct((N, Cout, T * Ltile), out_dtype),
        grid_spec=pltpu.PrefetchScalarGridSpec(
            num_scalar_prefetch=0,
            grid=(N, T),
            in_specs=[
                pl.BlockSpec(memory_space=pl.ANY),               # flat input stays in HBM
                pl.BlockSpec((Cout, Kc), lambda n, t: (0, 0)),   # fused weight, resident
            ],
            out_specs=pl.BlockSpec((None, Cout, Ltile), lambda n, t: (n, 0, t)),
            scratch_shapes=[
                pltpu.VMEM((2, Cin, Lin_tile), compute_dtype),   # halo double buffer
                pltpu.VMEM((Kc, Ltile), compute_dtype),          # fused-tap operand
                pltpu.SemaphoreType.DMA((2,)),
            ]),
        compiler_params=pltpu.CompilerParams(
            dimension_semantics=("parallel", "arbitrary"),
            vmem_limit_bytes=vmem_limit),
        cost_estimate=pl.CostEstimate(flops=flops, transcendentals=0,
                                      bytes_accessed=bytes_accessed),
    )(x_flat, w_cat)

    # Drop garbage tail + garbage columns (ow >= Wo); reshape is free (row-major).
    out = out_flat[:, :, :Lvalid].reshape(N, Cout, Ho, Wp)[:, :, :, :Wo]
    return out


# ----------------------------- self test -------------------------------------

def _conv_transpose_ref(x, w, stride, padding):
    """Scatter-form ConvTranspose2d reference (numpy, float64) == PyTorch."""
    x = np.asarray(x, np.float64)
    w = np.asarray(w, np.float64)
    N, Cin, H, W = x.shape
    _, Cout, kH, kW = w.shape
    sh, sw = stride
    ph, pw = padding
    Hfull = (H - 1) * sh + kH
    Wfull = (W - 1) * sw + kW
    full = np.zeros((N, Cout, Hfull, Wfull), np.float64)
    for ih in range(H):
        for iw in range(W):
            contrib = np.einsum("nc,cokl->nokl", x[:, :, ih, iw], w)
            full[:, :, ih * sh:ih * sh + kH, iw * sw:iw * sw + kW] += contrib
    Ho = Hfull - 2 * ph
    Wo = Wfull - 2 * pw
    return full[:, :, ph:ph + Ho, pw:pw + Wo]


def _check(x, w, stride, padding, compute_dtype, max_tile_lanes=None):
    y = reconstruct_filter_forward(x, w, stride, padding,
                                   compute_dtype=compute_dtype,
                                   max_tile_lanes=max_tile_lanes)
    y = jax.block_until_ready(y)
    ref = _conv_transpose_ref(x, w, stride, padding)
    assert y.shape == ref.shape, (y.shape, ref.shape)
    err = float(np.max(np.abs(np.asarray(y, np.float64) - ref)))
    tol = 0.05 * float(np.max(np.abs(ref))) + 1e-4   # loose: MXU may round to bf16
    assert err < tol, (err, tol, stride, padding, compute_dtype)
    return y


if __name__ == "__main__":
    key = jax.random.PRNGKey(0)
    k_w, k_x1, k_x2, k_x3 = jax.random.split(key, 4)

    # Synthetic "original conv layer": in_channels=3, out_channels=4, kernel 3x3.
    # conv_layer.weight shape (out_ch, in_ch, kH, kW) == ConvTranspose2d weight.
    weight = jax.random.normal(k_w, (4, 3, 3, 3), jnp.float32) * 0.1

    # 1) stride 2, padding 1, batch 2 (parallel N axis).  Also run with a forced
    #    128-lane tile so the double-buffered DMA pipeline (T > 1) is exercised.
    x1 = jax.random.normal(k_x1, (2, 4, 8, 8), jnp.float32)
    y1 = _check(x1, weight, (2, 2), (1, 1), jnp.float32)
    assert y1.shape == (2, 3, 15, 15), y1.shape
    _check(x1, weight, (2, 2), (1, 1), jnp.float32, max_tile_lanes=128)
    _check(x1, weight, (2, 2), (1, 1), jnp.bfloat16)       # default MXU dtype path

    # 2) stride 1, padding 0, non-square spatial.
    x2 = jax.random.normal(k_x2, (1, 4, 6, 9), jnp.float32)
    y2 = _check(x2, weight, (1, 1), (0, 0), jnp.float32)
    assert y2.shape == (1, 3, 8, 11), y2.shape

    # 3) padding > kernel_size - 1 (negative edge-pad / crop path).
    x3 = jax.random.normal(k_x3, (1, 4, 8, 8), jnp.float32)
    y3 = _check(x3, weight, (2, 2), (3, 3), jnp.float32)
    assert y3.shape == (1, 3, 11, 11), y3.shape

    print("KERNEL_OK")
</pallas_src>

<mosaic_0001>
module attributes {stable_mosaic.version = 11 : i64} {
  func.func @_deconv_kernel(%arg0: i32, %arg1: i32, %arg2: memref<2x4x391xf32, #tpu.memory_space<any>>, %arg3: memref<3x36xf32, #tpu.memory_space<vmem>>, %arg4: memref<1x3x256xf32, #tpu.memory_space<vmem>>, %arg5: memref<2x4x384xf32, #tpu.memory_space<vmem>>, %arg6: memref<36x256xf32, #tpu.memory_space<vmem>>, %arg7: memref<2x!tpu.dma_semaphore, #tpu.memory_space<semaphore_mem>>) attributes {dimension_semantics = [#tpu.dimension_semantics<parallel>, #tpu.dimension_semantics<arbitrary>], iteration_bounds = array<i64: 2, 1>, scalar_prefetch = 0 : i64, scratch_operands = 3 : i64, tpu.core_type = #tpu.core_type<tc>, window_params = [{}, {pipeline_mode = #tpu.pipeline_mode<synchronous>, transform_indices = @transform_1, window_bounds = array<i64: 3, 36>}, {transform_indices = @transform_2, window_bounds = array<i64: 1, 3, 256>}]} {
    %c2_i32 = arith.constant 2 : i32
    %0 = arith.remsi %arg1, %c2_i32 : i32
    %c0_i32 = arith.constant 0 : i32
    %1 = arith.cmpi eq, %arg1, %c0_i32 : i32
    %2 = arith.extui %1 : i1 to i32
    %c0_i32_0 = arith.constant 0 : i32
    %3 = arith.cmpi ne, %2, %c0_i32_0 : i32
    scf.if %3 {
      %c256_i32_50 = arith.constant 256 : i32
      %58 = arith.muli %arg1, %c256_i32_50 : i32
      %59 = tpu.assume_multiple %58, 128 : i32
      %c0_i32_51 = arith.constant 0 : i32
      %60 = tpu.memref_slice %arg2[%arg0, %c0_i32_51, %59] : memref<2x4x391xf32, #tpu.memory_space<any>> -> memref<1x4x384xf32, #tpu.memory_space<any>>
      %61 = tpu.memref_squeeze %60 : memref<1x4x384xf32, #tpu.memory_space<any>> -> memref<4x384xf32, #tpu.memory_space<any>>
      %c0_i32_52 = arith.constant 0 : i32
      %c0_i32_53 = arith.constant 0 : i32
      %62 = tpu.memref_slice %arg5[%0, %c0_i32_52, %c0_i32_53] : memref<2x4x384xf32, #tpu.memory_space<vmem>> -> memref<1x4x384xf32, #tpu.memory_space<vmem>>
      %63 = tpu.memref_squeeze %62 : memref<1x4x384xf32, #tpu.memory_space<vmem>> -> memref<4x384xf32, #tpu.memory_space<vmem>>
      %64 = tpu.memref_slice %arg7[%0] : memref<2x!tpu.dma_semaphore, #tpu.memory_space<semaphore_mem>> -> memref<1x!tpu.dma_semaphore, #tpu.memory_space<semaphore_mem>>
      %65 = tpu.memref_squeeze %64 : memref<1x!tpu.dma_semaphore, #tpu.memory_space<semaphore_mem>> -> memref<!tpu.dma_semaphore, #tpu.memory_space<semaphore_mem>>
      tpu.enqueue_dma source(%61 : memref<4x384xf32, #tpu.memory_space<any>>) target(%63 : memref<4x384xf32, #tpu.memory_space<vmem>>) target_semaphore(%65 : memref<!tpu.dma_semaphore, #tpu.memory_space<semaphore_mem>>)
    } else {
    }
    %c256_i32 = arith.constant 256 : i32
    %4 = arith.muli %arg1, %c256_i32 : i32
    %5 = tpu.assume_multiple %4, 128 : i32
    %c0_i32_1 = arith.constant 0 : i32
    %6 = tpu.memref_slice %arg2[%arg0, %c0_i32_1, %5] : memref<2x4x391xf32, #tpu.memory_space<any>> -> memref<1x4x384xf32, #tpu.memory_space<any>>
    %7 = tpu.memref_squeeze %6 : memref<1x4x384xf32, #tpu.memory_space<any>> -> memref<4x384xf32, #tpu.memory_space<any>>
    %c0_i32_2 = arith.constant 0 : i32
    %c0_i32_3 = arith.constant 0 : i32
    %8 = tpu.memref_slice %arg5[%0, %c0_i32_2, %c0_i32_3] : memref<2x4x384xf32, #tpu.memory_space<vmem>> -> memref<1x4x384xf32, #tpu.memory_space<vmem>>
    %9 = tpu.memref_squeeze %8 : memref<1x4x384xf32, #tpu.memory_space<vmem>> -> memref<4x384xf32, #tpu.memory_space<vmem>>
    %10 = tpu.memref_slice %arg7[%0] : memref<2x!tpu.dma_semaphore, #tpu.memory_space<semaphore_mem>> -> memref<1x!tpu.dma_semaphore, #tpu.memory_space<semaphore_mem>>
    %11 = tpu.memref_squeeze %10 : memref<1x!tpu.dma_semaphore, #tpu.memory_space<semaphore_mem>> -> memref<!tpu.dma_semaphore, #tpu.memory_space<semaphore_mem>>
    tpu.wait_dma2 semaphore(%11 : memref<!tpu.dma_semaphore, #tpu.memory_space<semaphore_mem>>) src(%7 : memref<4x384xf32, #tpu.memory_space<any>>) dst(%9 : memref<4x384xf32, #tpu.memory_space<vmem>>)
    %c1_i32 = arith.constant 1 : i32
    %12 = arith.addi %arg1, %c1_i32 : i32
    %c1_i32_4 = arith.constant 1 : i32
    %13 = arith.cmpi slt, %12, %c1_i32_4 : i32
    %14 = arith.extui %13 : i1 to i32
    %c0_i32_5 = arith.constant 0 : i32
    %15 = arith.cmpi ne, %14, %c0_i32_5 : i32
    scf.if %15 {
      %c1_i32_50 = arith.constant 1 : i32
      %58 = arith.addi %arg1, %c1_i32_50 : i32
      %c1_i32_51 = arith.constant 1 : i32
      %59 = arith.subi %c1_i32_51, %0 : i32
      %c256_i32_52 = arith.constant 256 : i32
      %60 = arith.muli %58, %c256_i32_52 : i32
      %61 = tpu.assume_multiple %60, 128 : i32
      %c0_i32_53 = arith.constant 0 : i32
      %62 = tpu.memref_slice %arg2[%arg0, %c0_i32_53, %61] : memref<2x4x391xf32, #tpu.memory_space<any>> -> memref<1x4x384xf32, #tpu.memory_space<any>>
      %63 = tpu.memref_squeeze %62 : memref<1x4x384xf32, #tpu.memory_space<any>> -> memref<4x384xf32, #tpu.memory_space<any>>
      %c0_i32_54 = arith.constant 0 : i32
      %c0_i32_55 = arith.constant 0 : i32
      %64 = tpu.memref_slice %arg5[%59, %c0_i32_54, %c0_i32_55] : memref<2x4x384xf32, #tpu.memory_space<vmem>> -> memref<1x4x384xf32, #tpu.memory_space<vmem>>
      %65 = tpu.memref_squeeze %64 : memref<1x4x384xf32, #tpu.memory_space<vmem>> -> memref<4x384xf32, #tpu.memory_space<vmem>>
      %66 = tpu.memref_slice %arg7[%59] : memref<2x!tpu.dma_semaphore, #tpu.memory_space<semaphore_mem>> -> memref<1x!tpu.dma_semaphore, #tpu.memory_space<semaphore_mem>>
      %67 = tpu.memref_squeeze %66 : memref<1x!tpu.dma_semaphore, #tpu.memory_space<semaphore_mem>> -> memref<!tpu.dma_semaphore, #tpu.memory_space<semaphore_mem>>
      tpu.enqueue_dma source(%63 : memref<4x384xf32, #tpu.memory_space<any>>) target(%65 : memref<4x384xf32, #tpu.memory_space<vmem>>) target_semaphore(%67 : memref<!tpu.dma_semaphore, #tpu.memory_space<semaphore_mem>>)
    } else {
    }
    %c0_i32_6 = arith.constant 0 : i32
    %c0_i32_7 = arith.constant 0 : i32
    %16 = tpu.memref_slice %arg5[%0, %c0_i32_6, %c0_i32_7] : memref<2x4x384xf32, #tpu.memory_space<vmem>> -> memref<1x4x384xf32, #tpu.memory_space<vmem>>
    %17 = tpu.memref_squeeze %16 : memref<1x4x384xf32, #tpu.memory_space<vmem>> -> memref<4x384xf32, #tpu.memory_space<vmem>>
    %c0 = arith.constant 0 : index
    %c0_8 = arith.constant 0 : index
    %18 = vector.load %17[%c0, %c0_8] : memref<4x384xf32, #tpu.memory_space<vmem>>, vector<4x256xf32>
    %c0_9 = arith.constant 0 : index
    %c0_10 = arith.constant 0 : index
    %19 = vector.load %arg6[%c0_9, %c0_10] : memref<36x256xf32, #tpu.memory_space<vmem>>, vector<4x256xf32>
    tpu.vector_store %arg6[%c0_9, %c0_10], %18 {strides = array<i32>} : memref<36x256xf32, #tpu.memory_space<vmem>>, vector<4x256xf32>,
    %c0_i32_11 = arith.constant 0 : i32
    %c0_i32_12 = arith.constant 0 : i32
    %20 = tpu.memref_slice %arg5[%0, %c0_i32_11, %c0_i32_12] : memref<2x4x384xf32, #tpu.memory_space<vmem>> -> memref<1x4x384xf32, #tpu.memory_space<vmem>>
    %21 = tpu.memref_squeeze %20 : memref<1x4x384xf32, #tpu.memory_space<vmem>> -> memref<4x384xf32, #tpu.memory_space<vmem>>
    %c0_13 = arith.constant 0 : index
    %c1 = arith.constant 1 : index
    %22 = vector.load %21[%c0_13, %c1] : memref<4x384xf32, #tpu.memory_space<vmem>>, vector<4x256xf32>
    %c4 = arith.constant 4 : index
    %c0_14 = arith.constant 0 : index
    %23 = vector.load %arg6[%c4, %c0_14] : memref<36x256xf32, #tpu.memory_space<vmem>>, vector<4x256xf32>
    tpu.vector_store %arg6[%c4, %c0_14], %22 {strides = array<i32>} : memref<36x256xf32, #tpu.memory_space<vmem>>, vector<4x256xf32>,
    %c0_i32_15 = arith.constant 0 : i32
    %c0_i32_16 = arith.constant 0 : i32
    %24 = tpu.memref_slice %arg5[%0, %c0_i32_15, %c0_i32_16] : memref<2x4x384xf32, #tpu.memory_space<vmem>> -> memref<1x4x384xf32, #tpu.memory_space<vmem>>
    %25 = tpu.memref_squeeze %24 : memref<1x4x384xf32, #tpu.memory_space<vmem>> -> memref<4x384xf32, #tpu.memory_space<vmem>>
    %c0_17 = arith.constant 0 : index
    %c2 = arith.constant 2 : index
    %26 = vector.load %25[%c0_17, %c2] : memref<4x384xf32, #tpu.memory_space<vmem>>, vector<4x256xf32>
    %c8 = arith.constant 8 : index
    %c0_18 = arith.constant 0 : index
    %27 = vector.load %arg6[%c8, %c0_18] : memref<36x256xf32, #tpu.memory_space<vmem>>, vector<4x256xf32>
    tpu.vector_store %arg6[%c8, %c0_18], %26 {strides = array<i32>} : memref<36x256xf32, #tpu.memory_space<vmem>>, vector<4x256xf32>,
    %c0_i32_19 = arith.constant 0 : i32
    %c0_i32_20 = arith.constant 0 : i32
    %28 = tpu.memref_slice %arg5[%0, %c0_i32_19, %c0_i32_20] : memref<2x4x384xf32, #tpu.memory_space<vmem>> -> memref<1x4x384xf32, #tpu.memory_space<vmem>>
    %29 = tpu.memref_squeeze %28 : memref<1x4x384xf32, #tpu.memory_space<vmem>> -> memref<4x384xf32, #tpu.memory_space<vmem>>
    %c0_21 = arith.constant 0 : index
    %c17 = arith.constant 17 : index
    %30 = vector.load %29[%c0_21, %c17] : memref<4x384xf32, #tpu.memory_space<vmem>>, vector<4x256xf32>
    %c12 = arith.constant 12 : index
    %c0_22 = arith.constant 0 : index
    %31 = vector.load %arg6[%c12, %c0_22] : memref<36x256xf32, #tpu.memory_space<vmem>>, vector<4x256xf32>
    tpu.vector_store %arg6[%c12, %c0_22], %30 {strides = array<i32>} : memref<36x256xf32, #tpu.memory_space<vmem>>, vector<4x256xf32>,
    %c0_i32_23 = arith.constant 0 : i32
    %c0_i32_24 = arith.constant 0 : i32
    %32 = tpu.memref_slice %arg5[%0, %c0_i32_23, %c0_i32_24] : memref<2x4x384xf32, #tpu.memory_space<vmem>> -> memref<1x4x384xf32, #tpu.memory_space<vmem>>
    %33 = tpu.memref_squeeze %32 : memref<1x4x384xf32, #tpu.memory_space<vmem>> -> memref<4x384xf32, #tpu.memory_space<vmem>>
    %c0_25 = arith.constant 0 : index
    %c18 = arith.constant 18 : index
    %34 = vector.load %33[%c0_25, %c18] : memref<4x384xf32, #tpu.memory_space<vmem>>, vector<4x256xf32>
    %c16 = arith.constant 16 : index
    %c0_26 = arith.constant 0 : index
    %35 = vector.load %arg6[%c16, %c0_26] : memref<36x256xf32, #tpu.memory_space<vmem>>, vector<4x256xf32>
    tpu.vector_store %arg6[%c16, %c0_26], %34 {strides = array<i32>} : memref<36x256xf32, #tpu.memory_space<vmem>>, vector<4x256xf32>,
    %c0_i32_27 = arith.constant 0 : i32
    %c0_i32_28 = arith.constant 0 : i32
    %36 = tpu.memref_slice %arg5[%0, %c0_i32_27, %c0_i32_28] : memref<2x4x384xf32, #tpu.memory_space<vmem>> -> memref<1x4x384xf32, #tpu.memory_space<vmem>>
    %37 = tpu.memref_squeeze %36 : memref<1x4x384xf32, #tpu.memory_space<vmem>> -> memref<4x384xf32, #tpu.memory_space<vmem>>
    %c0_29 = arith.constant 0 : index
    %c19 = arith.constant 19 : index
    %38 = vector.load %37[%c0_29, %c19] : memref<4x384xf32, #tpu.memory_space<vmem>>, vector<4x256xf32>
    %c20 = arith.constant 20 : index
    %c0_30 = arith.constant 0 : index
    %39 = vector.load %arg6[%c20, %c0_30] : memref<36x256xf32, #tpu.memory_space<vmem>>, vector<4x256xf32>
    tpu.vector_store %arg6[%c20, %c0_30], %38 {strides = array<i32>} : memref<36x256xf32, #tpu.memory_space<vmem>>, vector<4x256xf32>,
    %c0_i32_31 = arith.constant 0 : i32
    %c0_i32_32 = arith.constant 0 : i32
    %40 = tpu.memref_slice %arg5[%0, %c0_i32_31, %c0_i32_32] : memref<2x4x384xf32, #tpu.memory_space<vmem>> -> memref<1x4x384xf32, #tpu.memory_space<vmem>>
    %41 = tpu.memref_squeeze %40 : memref<1x4x384xf32, #tpu.memory_space<vmem>> -> memref<4x384xf32, #tpu.memory_space<vmem>>
    %c0_33 = arith.constant 0 : index
    %c34 = arith.constant 34 : index
    %42 = vector.load %41[%c0_33, %c34] : memref<4x384xf32, #tpu.memory_space<vmem>>, vector<4x256xf32>
    %c24 = arith.constant 24 : index
    %c0_34 = arith.constant 0 : index
    %43 = vector.load %arg6[%c24, %c0_34] : memref<36x256xf32, #tpu.memory_space<vmem>>, vector<4x256xf32>
    tpu.vector_store %arg6[%c24, %c0_34], %42 {strides = array<i32>} : memref<36x256xf32, #tpu.memory_space<vmem>>, vector<4x256xf32>,
    %c0_i32_35 = arith.constant 0 : i32
    %c0_i32_36 = arith.constant 0 : i32
    %44 = tpu.memref_slice %arg5[%0, %c0_i32_35, %c0_i32_36] : memref<2x4x384xf32, #tpu.memory_space<vmem>> -> memref<1x4x384xf32, #tpu.memory_space<vmem>>
    %45 = tpu.memref_squeeze %44 : memref<1x4x384xf32, #tpu.memory_space<vmem>> -> memref<4x384xf32, #tpu.memory_space<vmem>>
    %c0_37 = arith.constant 0 : index
    %c35 = arith.constant 35 : index
    %46 = vector.load %45[%c0_37, %c35] : memref<4x384xf32, #tpu.memory_space<vmem>>, vector<4x256xf32>
    %c28 = arith.constant 28 : index
    %c0_38 = arith.constant 0 : index
    %47 = vector.load %arg6[%c28, %c0_38] : memref<36x256xf32, #tpu.memory_space<vmem>>, vector<4x256xf32>
    tpu.vector_store %arg6[%c28, %c0_38], %46 {strides = array<i32>} : memref<36x256xf32, #tpu.memory_space<vmem>>, vector<4x256xf32>,
    %c0_i32_39 = arith.constant 0 : i32
    %c0_i32_40 = arith.constant 0 : i32
    %48 = tpu.memref_slice %arg5[%0, %c0_i32_39, %c0_i32_40] : memref<2x4x384xf32, #tpu.memory_space<vmem>> -> memref<1x4x384xf32, #tpu.memory_space<vmem>>
    %49 = tpu.memref_squeeze %48 : memref<1x4x384xf32, #tpu.memory_space<vmem>> -> memref<4x384xf32, #tpu.memory_space<vmem>>
    %c0_41 = arith.constant 0 : index
    %c36 = arith.constant 36 : index
    %50 = vector.load %49[%c0_41, %c36] : memref<4x384xf32, #tpu.memory_space<vmem>>, vector<4x256xf32>
    %c32 = arith.constant 32 : index
    %c0_42 = arith.constant 0 : index
    %51 = vector.load %arg6[%c32, %c0_42] : memref<36x256xf32, #tpu.memory_space<vmem>>, vector<4x256xf32>
    tpu.vector_store %arg6[%c32, %c0_42], %50 {strides = array<i32>} : memref<36x256xf32, #tpu.memory_space<vmem>>, vector<4x256xf32>,
    %c0_43 = arith.constant 0 : index
    %c0_44 = arith.constant 0 : index
    %52 = vector.load %arg3[%c0_43, %c0_44] : memref<3x36xf32, #tpu.memory_space<vmem>>, vector<3x36xf32>
    %c0_45 = arith.constant 0 : index
    %c0_46 = arith.constant 0 : index
    %53 = vector.load %arg6[%c0_45, %c0_46] : memref<36x256xf32, #tpu.memory_space<vmem>>, vector<36x256xf32>
    %cst = arith.constant dense<0.000000e+00> : vector<3x256xf32>
    %54 = tpu.matmul %52, %53, %cst {dimension_numbers = #tpu.dot_dimension_numbers<[1], [0], [0], [1], [0, 0, 1, 1], [], []>} : vector<3x36xf32>, vector<36x256xf32>, vector<3x256xf32> -> vector<3x256xf32>
    %c0_47 = arith.constant 0 : index
    %c0_48 = arith.constant 0 : index
    %c0_49 = arith.constant 0 : index
    %55 = vector.load %arg4[%c0_47, %c0_48, %c0_49] : memref<1x3x256xf32, #tpu.memory_space<vmem>>, vector<1x3x256xf32>
    %56 = vector.shape_cast %55 : vector<1x3x256xf32> to vector<3x256xf32>
    %57 = vector.shape_cast %54 : vector<3x256xf32> to vector<1x3x256xf32>
    tpu.vector_store %arg4[%c0_47, %c0_48, %c0_49], %57 {strides = array<i32>} : memref<1x3x256xf32, #tpu.memory_space<vmem>>, vector<1x3x256xf32>,
    return
  }
  func.func @transform_1(%arg0: i32, %arg1: i32) -> (i32, i32) {
    %c0_i32 = arith.constant 0 : i32
    %c0_i32_0 = arith.constant 0 : i32
    %c0_i32_1 = arith.constant 0 : i32
    return %c0_i32, %c0_i32_0 : i32, i32
  }
  func.func @transform_2(%arg0: i32, %arg1: i32) -> (i32, i32, i32) {
    %c0_i32 = arith.constant 0 : i32
    %c0_i32_0 = arith.constant 0 : i32
    return %arg0, %c0_i32, %arg1 : i32, i32, i32
  }
}

</mosaic_0001>

<bundles_post_ra>
// kernel: tpu_custom_call.1
= control target key start
LH: loop header
LB: loop body
LE: loop exit
PB: predicated region body
PF: predicated region fallthrough
CT: control target
= control target key end

     0   :  { %7 = vsyncpa [#allocation6], 0  ;;  %s762_s9 = smov 0   ;;  %s764_s10 = smov 0   ;;  %s848_s0 = inlined_call_operand.hbm [shape: f32[2,4,391], index: 0, kind: input, shape index: {}]   ;;  %s849_s1 = inlined_call_operand.hbm [shape: f32[3,36], index: 1, kind: input, shape index: {}]   ;;  %s850_s2 = inlined_call_operand.vmem [shape: f32[2,3,256], index: 2, kind: output, shape index: {}]  }
   0x1   :  { %s766_s11 = smov 0  }
   0x2 LB: > { %s585_s12 = sadd.s32 4294967295, %s735_s11   ;;  %s25_s13 = sadd.s32 1, %s731_s10  ;;  %s735_s11 = sphi %s766_s11, %s13_s11   ;;  %s731_s10 = sphi %s764_s10, %s852_s10   ;;  %s727_s9 = sphi %s762_s9, %s851_s9  }
   0x3   : > { %p27_p0 = scmp.ge.s32.totalorder %s25_s13, 2  ;;  %p587_p1 = scmp.ge.s32.totalorder %s735_s11, 1 }
   0x4   : > { %p79_p2 = scmp.lt.s32.totalorder %s735_s11, 3  ;;  %p617_p4 = scmp.eq.s32.totalorder %s585_s12, 0 }
   0x5   : > { %s854_s13 = smov (%p27_p0, %s25_s13), 0  ;;  %s91_s16 = sshll.u32 %s849_s1, 4  ;;  %s92_s16 = int_to_ptr.hbm [resolvable:$true] %s91_s16 }
   0x6   : > { %p80_p3 = pnand %p587_p1, %p79_p2  ;;  %s737_s17 = smov [#allocation5]  }
   0x7   : > { %s93_s18 = sshll.u32 %s737_s17, 4  ;;  %s94_s18 = int_to_ptr.vmem [resolvable:$true] %s93_s18 }
   0x8   : > { %p613_p5 = pneg %p80_p3  ;;  %106 = sbr.rel (%p80_p3) target bundleno = 385 (0x181), region = 24 }
   0xa   : > { %p614_p6 = pnand %p617_p4, %p613_p5 }
   0xc   : > { %616 = dma.hbm_to_vmem [thread:$0]  (!%p614_p6), %s92_s16, 64, %s94_s18, [#allocation6]  }
   0xd   : > { %720 = dma.done.wait (%p617_p4), [#allocation6], 64  }
   0xe   : > { %722 = vsyncadd (%p617_p4), [#allocation6], 4294967232  ;;  %p127_p7 = scmp.lt.s32.totalorder %s727_s9, 1  ;;  %s606_s19 = sshll.u32 %s727_s9, 4 }
   0xf   : > { %s152_s22 = scalar_lea.hbm %s848_s0, %s606_s19  ;;  %s738_s24 = smov [#allocation2]  }
  0x10   : > { %s856_s9 = smov (!%p127_p7, %s727_s9), 1  ;;  %s164_s23 = sshll.u32 %s152_s22, 4  ;;  %s165_s23 = int_to_ptr.hbm [resolvable:$true] %s164_s23 }
  0x11   : > { %s166_s25 = sshll.u32 %s738_s24, 4  ;;  %s605_s26 = sshll.u32 %s856_s9, 3  ;;  %s167_s25 = int_to_ptr.vmem [resolvable:$true] %s166_s25 }
  0x12   : > { %s790_s29 = scalar_lea.vmem %s850_s2, %s605_s26  ;;  %s683_s30 = sshra.s32 %s165_s23, 4  ;;  %s684_s30 = int_to_ptr.hbm [resolvable:$true] %s683_s30 }
  0x13   : > { %s685_s3 = scalar_lea.hbm %s684_s30, 12  ;;  %s687_s6 = scalar_lea.hbm %s848_s0, 32 }
  0x14   : > { %p686_p8 = scmp.ne.s32.totalorder %s684_s30, %s685_s3  ;;  %p688_p9 = scmp.lt.s32.totalorder %s684_s30, %s848_s0 }
  0x15   : > { %p689_p10 = scmp.lt.s32.totalorder %s687_s6, %s685_s3 }
  0x17   : > { %p690_p11 = por %p689_p10, %p688_p9 }
  0x19   : > { %p691_p12 = pnand %p690_p11, %p686_p8 }
  0x1b   : > { %694 = shalt.err (!%p691_p12)  }
  0x1c   : > { %169 = dma.hbm_to_vmem [thread:$0]  %s165_s23, 192, %s167_s25, [#allocation4] }
  0x1d   : > { %723 = dma.done.wait [#allocation4], 192 }
  0x1e   : > { %724 = vsyncadd [#allocation4], 4294967104  ;;  %v798_v0 = vld [vmem:[#allocation2] sm:$0xff]  ;;  %v219_v1 = vld [vmem:[#allocation2 + $0x8] sm:$0xf]  ;;  %s739_s9 = smov 127  }
  0x1f   : > { %211 = vst [vmem:[#allocation1] ss:$2 sm:$0xff] %v798_v0  ;;  %v243_v2 = vld [vmem:[#allocation2 + $0x8] sm:$0xf]  ;;  %s740_s12 = smov 126   ;;  %s741_s14 = smov 111  }
  0x20   : > { %225 = vst [vmem:[#allocation1 + $0x11] ss:$2 sm:$0xff] %v219_v1  ;;  %v266_v8 = vld [vmem:[#allocation2 + $0x8] sm:$0xf]  ;;  %s742_s15 = smov 110   ;;  %s743_s16 = smov 109  }
  0x21   : > { %v290_v12 = vld [vmem:[#allocation2 + $0x8] sm:$0xf]  ;;  %s744_s17 = smov 94   ;;  %s745_s18 = smov 93   ;;  %vm235_vm0 = vcmask 1039360   ;;  %vm258_vm1 = vcmask 1031168  }
  0x22   : > { %v313_v16 = vld [vmem:[#allocation2 + $0x8] sm:$0xf]  ;;  %s746_s19 = smov 92   ;;  %vm282_vm2 = vcmask 908288   ;;  %vm305_vm3 = vcmask 900096   ;;  %vm329_vm4 = vcmask 891904  }
  0x23   : > { %v337_v20 = vld [vmem:[#allocation2 + $0x8] sm:$0xf]  ;;  %vm376_vm5 = vcmask 760832   ;;  %vm352_vm6 = vcmask 769024   ;;  %vm399_vm7 = vcmask 752640   ;;  %vm421_vm8 = vcmask 1043456  }
  0x24   : > { %v360_v24 = vld [vmem:[#allocation2 + $0x8] sm:$0xf]  ;;  %vm417_vm9 = vcmask 293888  }
  0x25   : > { %v384_v28 = vld [vmem:[#allocation2 + $0x8] sm:$0xf] }
  0x26   : > { %v212_v3 = vld.sshfl [vmem:[#allocation1] sm:$0xff pattern:$0x75316420]  ;;  %v213_v4 = vld.sshfl [vmem:[#allocation1 + $0x8] sm:$0xff pattern:$0x75316420] }
  0x27   : > { %223 = vst [vmem:[#allocation1 + $0x1] ss:$2 sm:$0xff] %v798_v0  ;;  %v228_v5 = vld.sshfl [vmem:[#allocation1 + $0x10] sm:$0xff pattern:$0x75316420] }
  0x28   : > { %216 = vst [vmem:[#allocation3 + $0x30] sm:$0xf] %v212_v3  ;;  %233 = vrot.lane.b32.xlu2 %v228_v5, %s739_s9 }
  0x29   : > { %217 = vst [vmem:[#allocation3] sm:$0xf] %v213_v4 }
  0x2a   : > { %248 = vst [vmem:[#allocation1 + $0x10] ss:$2 sm:$0xff] %v243_v2 }
  0x2e   : > { %v227_v6 = vld.sshfl [vmem:[#allocation1 + $0x8] sm:$0xff pattern:$0x75316420]  ;;  %v803_v7 = vld.sshfl [vmem:[#allocation1] sm:$0xff pattern:$0x75316420] }
  0x2f   : > { %231 = vrot.lane.b32.xlu1 %v227_v6, %s739_s9  ;;  %246 = vst [vmem:[#allocation1] ss:$2 sm:$0xff] %v798_v0 }
  0x31   : > { %v251_v9 = vld.sshfl [vmem:[#allocation1 + $0x10] sm:$0xff pattern:$0x75316420] }
  0x32   : > { %256 = vrot.lane.b32.xlu2 %v251_v9, %s740_s12  ;;  %272 = vst [vmem:[#allocation1 + $0x11] ss:$2 sm:$0xff] %v266_v8 }
  0x36   : > { %v250_v10 = vld.sshfl [vmem:[#allocation1 + $0x8] sm:$0xff pattern:$0x75316420]  ;;  %v249_v11 = vld.sshfl [vmem:[#allocation1] sm:$0xff pattern:$0x75316420] }
  0x37   : > { %254 = vrot.lane.b32.xlu1 %v250_v10, %s740_s12  ;;  %270 = vst [vmem:[#allocation1 + $0x1] ss:$2 sm:$0xff] %v798_v0 }
  0x39   : > { %v275_v13 = vld.sshfl [vmem:[#allocation1 + $0x10] sm:$0xff pattern:$0x75316420] }
  0x3a   : > { %295 = vst [vmem:[#allocation1 + $0x10] ss:$2 sm:$0xff] %v290_v12 }
  0x3e   : > { %v273_v14 = vld.sshfl [vmem:[#allocation1] sm:$0xff pattern:$0x75316420]  ;;  %v274_v15 = vld.sshfl [vmem:[#allocation1 + $0x8] sm:$0xff pattern:$0x75316420] }
  0x3f   : > { %280 = vrot.lane.b32.xlu1 %v275_v13, %s741_s14  ;;  %278 = vrot.lane.b32.xlu0 %v274_v15, %s741_s14  ;;  %293 = vst [vmem:[#allocation1] ss:$2 sm:$0xff] %v798_v0 }
  0x41   : > { %v298_v17 = vld.sshfl [vmem:[#allocation1 + $0x10] sm:$0xff pattern:$0x75316420] }
  0x42   : > { %303 = vrot.lane.b32.xlu2 %v298_v17, %s742_s15  ;;  %319 = vst [vmem:[#allocation1 + $0x11] ss:$2 sm:$0xff] %v313_v16 }
  0x46   : > { %v297_v18 = vld.sshfl [vmem:[#allocation1 + $0x8] sm:$0xff pattern:$0x75316420]  ;;  %v296_v19 = vld.sshfl [vmem:[#allocation1] sm:$0xff pattern:$0x75316420] }
  0x47   : > { %301 = vrot.lane.b32.xlu1 %v297_v18, %s742_s15  ;;  %317 = vst [vmem:[#allocation1 + $0x1] ss:$2 sm:$0xff] %v798_v0 }
  0x49   : > { %v322_v21 = vld.sshfl [vmem:[#allocation1 + $0x10] sm:$0xff pattern:$0x75316420] }
  0x4a   : > { %342 = vst [vmem:[#allocation1 + $0x10] ss:$2 sm:$0xff] %v337_v20  ;;  %299 = vrot.lane.b32.xlu2 %v296_v19, %s742_s15 }
  0x4e   : > { %v321_v22 = vld.sshfl [vmem:[#allocation1 + $0x8] sm:$0xff pattern:$0x75316420]  ;;  %v320_v23 = vld.sshfl [vmem:[#allocation1] sm:$0xff pattern:$0x75316420] }
  0x4f   : > { %327 = vrot.lane.b32.xlu1 %v322_v21, %s743_s16  ;;  %325 = vrot.lane.b32.xlu0 %v321_v22, %s743_s16  ;;  %340 = vst [vmem:[#allocation1] ss:$2 sm:$0xff] %v798_v0 }
  0x51   : > { %v345_v25 = vld.sshfl [vmem:[#allocation1 + $0x10] sm:$0xff pattern:$0x75316420] }
  0x52   : > { %366 = vst [vmem:[#allocation1 + $0x11] ss:$2 sm:$0xff] %v360_v24 }
  0x56   : > { %v344_v26 = vld.sshfl [vmem:[#allocation1 + $0x8] sm:$0xff pattern:$0x75316420]  ;;  %v343_v27 = vld.sshfl [vmem:[#allocation1] sm:$0xff pattern:$0x75316420] }
  0x57   : > { %350 = vrot.lane.b32.xlu1 %v345_v25, %s744_s17  ;;  %323 = vrot.lane.b32.xlu0 %v320_v23, %s743_s16  ;;  %364 = vst [vmem:[#allocation1 + $0x1] ss:$2 sm:$0xff] %v798_v0 }
  0x59   : > { %v369_v29 = vld.sshfl [vmem:[#allocation1 + $0x10] sm:$0xff pattern:$0x75316420] }
  0x5a   : > { %389 = vst [vmem:[#allocation1 + $0x10] ss:$2 sm:$0xff] %v384_v28  ;;  %374 = vrot.lane.b32.xlu2 %v369_v29, %s745_s18 }
  0x5e   : > { %v368_v30 = vld.sshfl [vmem:[#allocation1 + $0x8] sm:$0xff pattern:$0x75316420]  ;;  %v367_v31 = vld.sshfl [vmem:[#allocation1] sm:$0xff pattern:$0x75316420] }
  0x5f   : > { %348 = vrot.lane.b32.xlu1 %v344_v26, %s744_s17  ;;  %387 = vst [vmem:[#allocation1] ss:$2 sm:$0xff] %v798_v0 }
  0x61   : > { %v392_v32 = vld.sshfl [vmem:[#allocation1 + $0x10] sm:$0xff pattern:$0x75316420] }
  0x62   : > { %397 = vrot.lane.b32.xlu0 %v392_v32, %s746_s19  ;;  %346 = vrot.lane.b32.xlu2 %v343_v27, %s744_s17 }
  0x66   : > { %v391_v33 = vld.sshfl [vmem:[#allocation1 + $0x8] sm:$0xff pattern:$0x75316420]  ;;  %v390_v34 = vld.sshfl [vmem:[#allocation1] sm:$0xff pattern:$0x75316420] }
  0x67   : > { %276 = vrot.lane.b32.xlu1 %v273_v14, %s741_s14  ;;  %v406_v14 = vld [vmem:[#allocation5] sm:$0x7] }
  0x6a   : > { %372 = vrot.lane.b32.xlu2 %v368_v30, %s745_s18  ;;  %370 = vrot.lane.b32.xlu0 %v367_v31, %s745_s18 }
  0x72   : > { %229 = vrot.lane.b32.xlu2 %v803_v7, %s739_s9  ;;  %395 = vrot.lane.b32.xlu0 %v391_v33, %s746_s19 }
  0x7a   : > { %393 = vrot.lane.b32.xlu0 %v390_v34, %s746_s19 }
  0x82   : > { %252 = vrot.lane.b32.xlu0 %v249_v11, %s740_s12  ;;  %v234_v35 = vpop.permute.xlu2 %233 }
  0x8c   : > { %v257_v36 = vpop.permute.xlu2 %256 }
  0x9c   : > { %v304_v37 = vpop.permute.xlu2 %303 }
  0xa1   : > { %v232_v38 = vpop.permute.xlu1 %231 }
  0xa2   : > { %v237_v39 = vsel %vm235_vm0, %v232_v38, %v234_v35 }
  0xa3   : > { %241 = vst [vmem:[#allocation3] sm:$0xf0] %v237_v39 }
  0xa4   : > { %v300_v42 = vpop.permute.xlu2 %299 }
  0xa9   : > { %v822_v40 = vpop.permute.xlu1 %254 }
  0xaa   : > { %v260_v41 = vsel %vm258_vm1, %v822_v40, %v257_v36  ;;  %v408_v17 = vld [vmem:[#allocation3] sm:$0xff] }
  0xab   : > { %264 = vst [vmem:[#allocation3 + $0x10] sm:$0xf] %v260_v41 }
  0xb1   : > { %v281_v43 = vpop.permute.xlu1 %280  ;;  %v279_v44 = vpop.permute.xlu0 %278 }
  0xb2   : > { %v284_v45 = vsel %vm282_vm2, %v279_v44, %v281_v43 }
  0xb3   : > { %288 = vst [vmem:[#allocation3 + $0x10] sm:$0xf0] %v284_v45 }
  0xb4   : > { %v375_v46 = vpop.permute.xlu2 %374 }
  0xb9   : > { %v302_v47 = vpop.permute.xlu1 %301 }
  0xba   : > { %v306_v48 = vsel %vm305_vm3, %v300_v42, %v302_v47  ;;  %v307_v49 = vsel %vm305_vm3, %v302_v47, %v304_v37  ;;  %v410_v12 = vld [vmem:[#allocation3 + $0x10] sm:$0xff] }
  0xbb   : > { %310 = vst [vmem:[#allocation3 + $0x48] sm:$0xf] %v306_v48 }
  0xbc   : > { %311 = vst [vmem:[#allocation3 + $0x28] sm:$0xf] %v307_v49  ;;  %v347_v50 = vpop.permute.xlu2 %346 }
  0xc1   : > { %v328_v51 = vpop.permute.xlu1 %327  ;;  %v326_v52 = vpop.permute.xlu0 %325 }
  0xc2   : > { %v331_v53 = vsel %vm329_vm4, %v326_v52, %v328_v51 }
  0xc3   : > { %335 = vst [vmem:[#allocation3 + $0x28] sm:$0xf0] %v331_v53 }
  0xc4   : > { %v373_v54 = vpop.permute.xlu2 %372 }
  0xc5   : > { %v378_v55 = vsel %vm376_vm5, %v373_v54, %v375_v46 }
  0xc6   : > { %382 = vst [vmem:[#allocation3 + $0x20] sm:$0xf0] %v378_v55 }
  0xc9   : > { %v351_v56 = vpop.permute.xlu1 %350  ;;  %v324_v57 = vpop.permute.xlu0 %323 }
  0xca   : > { %v330_v58 = vsel %vm329_vm4, %v324_v57, %v326_v52  ;;  %v412_v11 = vld [vmem:[#allocation3 + $0x28] sm:$0xff] }
  0xcb   : > { %334 = vst [vmem:[#allocation3 + $0x48] sm:$0xf0] %v330_v58 }
  0xcc   : > { %v230_v59 = vpop.permute.xlu2 %229 }
  0xcd   : > { %v236_v60 = vsel %vm235_vm0, %v230_v59, %v232_v38 }
  0xce   : > { %240 = vst [vmem:[#allocation3 + $0x30] sm:$0xf0] %v236_v60 }
  0xd1   : > { %v349_v61 = vpop.permute.xlu1 %348 }
  0xd2   : > { %v353_v62 = vsel %vm352_vm6, %v347_v50, %v349_v61  ;;  %v354_v63 = vsel %vm352_vm6, %v349_v61, %v351_v56  ;;  %v411_v19 = vld [vmem:[#allocation3 + $0x48] sm:$0xff] }
  0xd3   : > { %357 = vst [vmem:[#allocation3 + $0x8] sm:$0xf] %v353_v62 }
  0xd4   : > { %v398_v0 = vpop.permute.xlu0 %397  ;;  %358 = vst [vmem:[#allocation3 + $0x20] sm:$0xf] %v354_v63 }
  0xd5   : > { %v407_v21 = vld [vmem:[#allocation3 + $0x30] sm:$0xff] }
  0xd9   : > { %v277_v1 = vpop.permute.xlu1 %276 }
  0xda   : > { %v283_v2 = vsel %vm282_vm2, %v277_v1, %v279_v44 }
  0xdb   : > { %287 = vst [vmem:[#allocation3 + $0x18] sm:$0xf0] %v283_v2  ;;  %v414_v10 = vld [vmem:[#allocation3 + $0x20] sm:$0xff] }
  0xdc   : > { %v371_v3 = vpop.permute.xlu0 %370 }
  0xdd   : > { %v377_v4 = vsel %vm376_vm5, %v371_v3, %v373_v54 }
  0xde   : > { %381 = vst [vmem:[#allocation3 + $0x8] sm:$0xf0] %v377_v4 }
  0xe4   : > { %v396_v5 = vpop.permute.xlu0 %395 }
  0xe5   : > { %v401_v6 = vsel %vm399_vm7, %v396_v5, %v398_v0  ;;  %v413_v18 = vld [vmem:[#allocation3 + $0x8] sm:$0xff] }
  0xe6   : > { %405 = vst [vmem:[#allocation3 + $0x38] sm:$0xf] %v401_v6 }
  0xec   : > { %v394_v7 = vpop.permute.xlu0 %393 }
  0xed   : > { %v400_v8 = vsel %vm399_vm7, %v394_v7, %v396_v5  ;;  %v416_v9 = vld [vmem:[#allocation3 + $0x38] sm:$0xf] }
  0xee   : > { %404 = vst [vmem:[#allocation3 + $0x40] sm:$0xf] %v400_v8  ;;  %599 = vmatpush.msk.msra.mxu1 %vm421_vm8, %v416_v9 }
  0xf0   : > { %460 = vmatpush.msra.mxu1 %v414_v10 }
  0xf2   : > { %461 = vmatpush.msra.mxu1 %v412_v11 }
  0xf4   : > { %462 = vmatpush.msra.mxu1 %v410_v12  ;;  %v253_v13 = vpop.permute.xlu0 %252 }
  0xf5   : > { %v259_v15 = vsel %vm258_vm1, %v253_v13, %v822_v40  ;;  %v415_v16 = vld [vmem:[#allocation3 + $0x40] sm:$0xf] }
  0xf6   : > { %263 = vst [vmem:[#allocation3 + $0x18] sm:$0xf] %v259_v15  ;;  %597 = vmatpush.msk.msra.mxu0 %vm421_vm8, %v415_v16  ;;  %463 = vmatpush.msra.mxu1 %v408_v17 }
  0xf7   : > { %600 = vmatmul.msk.f32.vlgmr.msra.gmra.mxu1 %vm417_vm9, %v406_v14 }
  0xf8   : > { %440 = vmatpush.msra.mxu0 %v413_v18 }
  0xfa   : > { %441 = vmatpush.msra.mxu0 %v411_v19 }
  0xfd   : > { %v409_v20 = vld [vmem:[#allocation3 + $0x18] sm:$0xff] }
  0xfe   : > { %442 = vmatpush.msra.mxu0 %v409_v20 }
 0x100   : > { %443 = vmatpush.msra.mxu0 %v407_v21 }
 0x101   : > { %598 = vmatmul.msk.f32.vlgmr.msra.gmra.mxu0 %vm417_vm9, %v406_v14 }
 0x174   : > { %v465_v22 = vpop.f32.mrf.mxu1 }
 0x175   : > { %v470_v23 = vrot.slane %v465_v22, 4 }
 0x17e   : > { %v445_v24 = vpop.f32.mrf.mxu0 }
 0x17f   : > { %v471_v25 = vsel %vm421_vm8, %v445_v24, %v470_v23 }
 0x180   : > { %473 = vst [vmem:[%s790_s29] sm:$0x77] %v471_v25 }
 0x181 PF: > { %s13_s11 = sadd.s32 1, %s735_s11   ;;  %s851_s9 = smov %s731_s10 }
 0x182   : > { %p10_p13 = scmp.ge.s32.totalorder %s13_s11, 4   ;;  %s852_s10 = smov %s854_s13 }
 0x184   :  { %12 = sbr.rel (!%p10_p13) target bundleno = 2 (0x2), region = 93 }
 0x189   :  { %504 = vsyncpa [#allocation6], 1 }
 0x18a   :  { %506 = vsyncpa [#allocation6 + $0x1], 1 }
 0x18b   :  { %507 = vsyncmov [#allocation4] }
 0x18e   :  { %s508_s20 = vpop.sfrf %507 }
 0x18f   :  { %p603_p0 = scmp.ne.s32.totalorder %s508_s20, 0 }
 0x191   :  { %512 = shalt.err (%p603_p0)  }
 0x192   :  { %514 = vsyncmov [#allocation4 + $0x1] }
 0x195   :  { %s515_s21 = vpop.sfrf %514 }
 0x196   :  { %p604_p1 = scmp.ne.s32.totalorder %s515_s21, 0 }
 0x198   :  { %519 = shalt.err (%p604_p1)  }

</bundles_post_ra>
